<compile_context>
chip_gen: v7x
topology: tpu7x:2x2x1
jax: 0.10.0
libtpu: 0.0.40
codegen_flags: <defaults>
</compile_context>

<pallas_src>
import jax
import jax.numpy as jnp
import numpy as np
from jax.experimental import pallas as pl
from jax.experimental.pallas import tpu as pltpu


def _intent_field_kernel(pooled_ref, hidden_ref, idx_ref, mask_ref,
                         wi_ref, bi_ref, wf_ref, bf_ref,
                         intent_ref, field_ref):
    pooled = pooled_ref[...]              # (TB, H)      bf16
    idx = idx_ref[...]                    # (TB, Fn, T)  int32
    mask = mask_ref[...]                  # (TB, Fn, T)  f32
    hidden = hidden_ref[...]              # (TB, S, H)   bf16

    tb, fn, tt = idx.shape
    s = hidden.shape[1]

    # ---- intent head: (TB,H) @ (H,CP) bf16 MXU, f32 acc, f32 bias ----------
    intent = jnp.dot(pooled, wi_ref[...],
                     preferred_element_type=jnp.float32) + bi_ref[...]
    intent_ref[...] = intent.astype(intent_ref.dtype)        # dense (tb,128) store

    # ---- field3 head: (TB,H) @ (H,H) bf16 MXU, f32 acc, f32 bias -----------
    f2f1 = jnp.dot(pooled, wf_ref[...],
                   preferred_element_type=jnp.float32) + bf_ref[...]   # (TB,H) f32

    # ---- selection matrix M[b,f,s] = sum_t mask[b,f,t] * (idx[b,f,t] == s)
    #      built with a short unrolled loop over T (T is small): only a single
    #      (TB,Fn,S) f32 accumulator stays live, no 4-D intermediate. ---------
    iota_s = jax.lax.broadcasted_iota(jnp.int32, (tb, fn, s), 2)
    m_sel = jnp.zeros((tb, fn, s), jnp.float32)
    for t in range(tt):                                        # static unroll
        hit = idx[:, :, t][..., None] == iota_s
        m_sel = m_sel + jnp.where(hit, mask[:, :, t][..., None], 0.0)

    # ---- reordered contraction:  field = M @ (hidden @ f2f1) ---------------
    # v[b,s] = hidden[b] @ f2f1[b]  (bf16 MXU operands, f32 accumulate)
    v = jnp.einsum('bsh,bhx->bsx', hidden, f2f1.astype(hidden.dtype)[:, :, None],
                   preferred_element_type=jnp.float32)[:, :, 0]        # (TB,S) f32
    # field[b,f] = sum_s M[b,f,s] * v[b,s]  (tiny; VPU mul + lane reduce)
    field = jnp.sum(m_sel * v[:, None, :], axis=-1)                    # (TB,Fn) f32

    # ---- one unmasked full-width (tb, FP) store -----------------------------
    fp = field_ref.shape[-1]
    if fp > fn:
        field = jnp.concatenate(
            [field, jnp.zeros((tb, fp - fn), field.dtype)], axis=-1)
    field_ref[...] = field.astype(field_ref.dtype)


def _vmem_limit_bytes(tb, S, H, Fn, T, CP, FP):
    bf2, f4, i4 = 2, 4, 4
    stream = 2 * (tb * S * H * bf2 + tb * H * bf2 + tb * Fn * T * (i4 + f4))
    weights = 2 * ((H * CP + H * H) * bf2 + (CP + H) * f4)
    outs = 2 * tb * (CP + FP) * f4
    live = tb * (Fn * S + S + H + CP + FP) * f4
    need = stream + weights + outs + live
    # Headroom for compiler scratch; cap at 48 MiB so it also fits v7x (64 MiB).
    return int(min(max(2 * need, 32 * 2**20), 48 * 2**20))


def intent_field_finder(pooled_output, last_hidden_state, field_indices,
                        field_token_masks, w_intent, b_intent,
                        w_field3, b_field3, tb=8):
    B, S, H = last_hidden_state.shape
    _, Fn, T = field_indices.shape
    C = w_intent.shape[1]

    tb = max(8, ((int(tb) + 7) // 8) * 8)   # sublane-dense batch tile
    CP = ((C + 127) // 128) * 128           # lane-dense intent width
    FP = ((Fn + 127) // 128) * 128          # lane-dense field width

    nb = int(pl.cdiv(B, tb))
    B_pad = nb * tb

    pooled2 = pooled_output.astype(jnp.bfloat16)                 # (B, H) bf16
    hidden = last_hidden_state.astype(jnp.bfloat16)              # halve the HBM stream
    mask3 = field_token_masks.astype(jnp.float32).reshape(B, Fn, T)
    idx3 = field_indices.astype(jnp.int32)

    if B_pad != B:                       # pad batch so every grid step is full
        pb = B_pad - B
        pooled2 = jnp.pad(pooled2, ((0, pb), (0, 0)))
        hidden = jnp.pad(hidden, ((0, pb), (0, 0), (0, 0)))
        idx3 = jnp.pad(idx3, ((0, pb), (0, 0), (0, 0)))
        mask3 = jnp.pad(mask3, ((0, pb), (0, 0), (0, 0)))

    # Zero-pad intent weights/bias to CP lanes; MXU operands go to bf16,
    # biases stay f32 and are added after the dot.
    wi_pad = jnp.pad(w_intent, ((0, 0), (0, CP - C))).astype(jnp.bfloat16)
    bi_pad = jnp.pad(b_intent.astype(jnp.float32), (0, CP - C)).reshape(1, CP)
    wf = w_field3.astype(jnp.bfloat16)
    bf = b_field3.astype(jnp.float32).reshape(1, H)

    grid_spec = pltpu.PrefetchScalarGridSpec(
        num_scalar_prefetch=0,
        grid=(nb,),
        in_specs=[
            pl.BlockSpec((tb, H), lambda b: (b, 0)),          # pooled_output (bf16)
            pl.BlockSpec((tb, S, H), lambda b: (b, 0, 0)),    # last_hidden_state (bf16)
            pl.BlockSpec((tb, Fn, T), lambda b: (b, 0, 0)),   # field_indices
            pl.BlockSpec((tb, Fn, T), lambda b: (b, 0, 0)),   # field_token_masks
            pl.BlockSpec((H, CP), lambda b: (0, 0)),          # out_intent.weight^T (bf16, padded)
            pl.BlockSpec((1, CP), lambda b: (0, 0)),          # out_intent.bias (f32, padded)
            pl.BlockSpec((H, H), lambda b: (0, 0)),           # field3.weight^T (bf16)
            pl.BlockSpec((1, H), lambda b: (0, 0)),           # field3.bias (f32)
        ],
        out_specs=[
            pl.BlockSpec((tb, CP), lambda b: (b, 0)),         # intent (lane-padded)
            pl.BlockSpec((tb, FP), lambda b: (b, 0)),         # field  (lane-padded)
        ],
    )

    intent_p, field_p = pl.pallas_call(
        _intent_field_kernel,
        out_shape=(jax.ShapeDtypeStruct((B_pad, CP), jnp.float32),
                   jax.ShapeDtypeStruct((B_pad, FP), jnp.float32)),
        grid_spec=grid_spec,
        compiler_params=pltpu.CompilerParams(
            dimension_semantics=("parallel",),
            vmem_limit_bytes=_vmem_limit_bytes(tb, S, H, Fn, T, CP, FP)),
    )(pooled2, hidden, idx3, mask3, wi_pad, bi_pad, wf, bf)

    return intent_p[:B, :C], field_p[:B, :Fn]


def _reference(pooled, hidden, idx, mask4, wi, bi, wf, bf):
    """Plain-JAX replica of the PyTorch forward (post-BERT part).

    The kernel deliberately streams hidden/pooled/weights through the MXU in
    bf16 (f32 accumulate, f32 biases); the reference quantizes the same
    operands so the tolerance stays tight, leaving only summation-order
    differences from the M @ (hidden @ f2f1) reorder.
    """
    f32 = jnp.float32
    pooled_q = pooled.astype(jnp.bfloat16).astype(f32)
    hidden_q = hidden.astype(jnp.bfloat16).astype(f32)
    wi_q = wi.astype(jnp.bfloat16).astype(f32)
    wf_q = wf.astype(jnp.bfloat16).astype(f32)

    B, S, H = hidden.shape
    _, Fn, T = idx.shape
    intent = pooled_q @ wi_q + bi
    f2f1 = pooled_q @ wf_q + bf
    f2f1_q = f2f1.astype(jnp.bfloat16).astype(f32)

    flat_hidden = hidden_q.reshape(B * S, H)
    offs = (jnp.arange(B, dtype=jnp.int32) * S)[:, None, None]
    flat_idx = (idx + offs).reshape(-1)
    gathered = flat_hidden[flat_idx].reshape(B, Fn, T, H) * mask4
    field_hidden = gathered.sum(axis=2)
    field = jnp.einsum('bfh,bh->bf', field_hidden, f2f1_q)
    return intent, field


if __name__ == "__main__":
    B, S, H = 16, 16, 32         # batch, max_seq_len, bert hidden_size
    Fn, T = 4, 4                 # max_field_num, max_token_num_per_field
    C = 8                        # n_classes
    TB = 8                       # batch elements per grid step -> grid length 2 (even)

    key = jax.random.PRNGKey(0)
    ks = jax.random.split(key, 8)

    # Synthetic "BERT outputs" (encoder not re-implemented).
    last_hidden_state = jax.random.normal(ks[0], (B, S, H), jnp.float32)
    pooled_output = jax.random.normal(ks[1], (B, H), jnp.float32)

    field_indices = jax.random.randint(ks[2], (B, Fn, T), 0, S, dtype=jnp.int32)
    field_token_masks = (jax.random.uniform(ks[3], (B, Fn, T, 1)) < 0.8
                         ).astype(jnp.float32)

    # Deterministic parameters (nn.Linear weights stored transposed: [in, out]).
    w_intent = 0.05 * jax.random.normal(ks[4], (H, C), jnp.float32)
    b_intent = 0.01 * jax.random.normal(ks[5], (C,), jnp.float32)
    w_field3 = 0.05 * jax.random.normal(ks[6], (H, H), jnp.float32)
    b_field3 = 0.01 * jax.random.normal(ks[7], (H,), jnp.float32)

    intent_out, field_out = intent_field_finder(
        pooled_output, last_hidden_state, field_indices, field_token_masks,
        w_intent, b_intent, w_field3, b_field3, tb=TB)
    jax.block_until_ready((intent_out, field_out))

    intent_ref, field_ref = _reference(
        pooled_output, last_hidden_state, field_indices, field_token_masks,
        w_intent, b_intent, w_field3, b_field3)

    np.testing.assert_allclose(np.asarray(intent_out), np.asarray(intent_ref),
                               rtol=1e-3, atol=1e-3)
    np.testing.assert_allclose(np.asarray(field_out), np.asarray(field_ref),
                               rtol=1e-3, atol=1e-3)

    print("KERNEL_OK")
</pallas_src>

<mosaic_0001>
module attributes {stable_mosaic.version = 11 : i64} {
  func.func @_intent_field_kernel(%arg0: i32, %arg1: memref<8x32xbf16, #tpu.memory_space<vmem>>, %arg2: memref<8x16x32xbf16, #tpu.memory_space<vmem>>, %arg3: memref<8x4x4xi32, #tpu.memory_space<vmem>>, %arg4: memref<8x4x4xf32, #tpu.memory_space<vmem>>, %arg5: memref<32x128xbf16, #tpu.memory_space<vmem>>, %arg6: memref<1x128xf32, #tpu.memory_space<vmem>>, %arg7: memref<32x32xbf16, #tpu.memory_space<vmem>>, %arg8: memref<1x32xf32, #tpu.memory_space<vmem>>, %arg9: memref<8x128xf32, #tpu.memory_space<vmem>>, %arg10: memref<8x128xf32, #tpu.memory_space<vmem>>) attributes {dimension_semantics = [#tpu.dimension_semantics<parallel>], iteration_bounds = array<i64: 2>, scalar_prefetch = 0 : i64, scratch_operands = 0 : i64, tpu.core_type = #tpu.core_type<tc>, window_params = [{transform_indices = @transform_0, window_bounds = array<i64: 8, 32>}, {transform_indices = @transform_1, window_bounds = array<i64: 8, 16, 32>}, {transform_indices = @transform_2, window_bounds = array<i64: 8, 4, 4>}, {transform_indices = @transform_3, window_bounds = array<i64: 8, 4, 4>}, {pipeline_mode = #tpu.pipeline_mode<synchronous>, transform_indices = @transform_4, window_bounds = array<i64: 32, 128>}, {pipeline_mode = #tpu.pipeline_mode<synchronous>, transform_indices = @transform_5, window_bounds = array<i64: 1, 128>}, {pipeline_mode = #tpu.pipeline_mode<synchronous>, transform_indices = @transform_6, window_bounds = array<i64: 32, 32>}, {pipeline_mode = #tpu.pipeline_mode<synchronous>, transform_indices = @transform_7, window_bounds = array<i64: 1, 32>}, {transform_indices = @transform_8, window_bounds = array<i64: 8, 128>}, {transform_indices = @transform_9, window_bounds = array<i64: 8, 128>}]} {
    %c0 = arith.constant 0 : index
    %c0_0 = arith.constant 0 : index
    %0 = vector.load %arg1[%c0, %c0_0] : memref<8x32xbf16, #tpu.memory_space<vmem>>, vector<8x32xbf16>
    %c0_1 = arith.constant 0 : index
    %c0_2 = arith.constant 0 : index
    %c0_3 = arith.constant 0 : index
    %1 = vector.load %arg3[%c0_1, %c0_2, %c0_3] : memref<8x4x4xi32, #tpu.memory_space<vmem>>, vector<8x4x4xi32>
    %c0_4 = arith.constant 0 : index
    %c0_5 = arith.constant 0 : index
    %c0_6 = arith.constant 0 : index
    %2 = vector.load %arg4[%c0_4, %c0_5, %c0_6] : memref<8x4x4xf32, #tpu.memory_space<vmem>>, vector<8x4x4xf32>
    %c0_7 = arith.constant 0 : index
    %c0_8 = arith.constant 0 : index
    %c0_9 = arith.constant 0 : index
    %3 = vector.load %arg2[%c0_7, %c0_8, %c0_9] : memref<8x16x32xbf16, #tpu.memory_space<vmem>>, vector<8x16x32xbf16>
    %c0_10 = arith.constant 0 : index
    %c0_11 = arith.constant 0 : index
    %4 = vector.load %arg5[%c0_10, %c0_11] : memref<32x128xbf16, #tpu.memory_space<vmem>>, vector<32x128xbf16>
    %cst = arith.constant dense<0.000000e+00> : vector<8x128xf32>
    %5 = tpu.matmul %0, %4, %cst {dimension_numbers = #tpu.dot_dimension_numbers<[1], [0], [0], [1], [0, 0, 1, 1], [], []>} : vector<8x32xbf16>, vector<32x128xbf16>, vector<8x128xf32> -> vector<8x128xf32>
    %c0_12 = arith.constant 0 : index
    %c0_13 = arith.constant 0 : index
    %6 = vector.load %arg6[%c0_12, %c0_13] : memref<1x128xf32, #tpu.memory_space<vmem>>, vector<1x128xf32>
    %7 = vector.broadcast %6 : vector<1x128xf32> to vector<8x128xf32>
    %8 = arith.addf %5, %7 : vector<8x128xf32>
    %c0_14 = arith.constant 0 : index
    %c0_15 = arith.constant 0 : index
    %9 = vector.load %arg9[%c0_14, %c0_15] : memref<8x128xf32, #tpu.memory_space<vmem>>, vector<8x128xf32>
    tpu.vector_store %arg9[%c0_14, %c0_15], %8 {strides = array<i32>} : memref<8x128xf32, #tpu.memory_space<vmem>>, vector<8x128xf32>,
    %c0_16 = arith.constant 0 : index
    %c0_17 = arith.constant 0 : index
    %10 = vector.load %arg7[%c0_16, %c0_17] : memref<32x32xbf16, #tpu.memory_space<vmem>>, vector<32x32xbf16>
    %cst_18 = arith.constant dense<0.000000e+00> : vector<8x32xf32>
    %11 = tpu.matmul %0, %10, %cst_18 {dimension_numbers = #tpu.dot_dimension_numbers<[1], [0], [0], [1], [0, 0, 1, 1], [], []>} : vector<8x32xbf16>, vector<32x32xbf16>, vector<8x32xf32> -> vector<8x32xf32>
    %c0_19 = arith.constant 0 : index
    %c0_20 = arith.constant 0 : index
    %12 = vector.load %arg8[%c0_19, %c0_20] : memref<1x32xf32, #tpu.memory_space<vmem>>, vector<1x32xf32>
    %13 = vector.broadcast %12 : vector<1x32xf32> to vector<8x32xf32>
    %14 = arith.addf %11, %13 : vector<8x32xf32>
    %15 = tpu.iota {dimensions = array<i32: 2>} : vector<8x4x16xi32>
    %cst_21 = arith.constant 0.000000e+00 : f32
    %16 = vector.broadcast %cst_21 : f32 to vector<8x4x16xf32>
    %17 = vector.extract_strided_slice %1 {offsets = [0, 0, 0], sizes = [8, 4, 1], strides = [1, 1, 1]} : vector<8x4x4xi32> to vector<8x4x1xi32>
    %18 = vector.shape_cast %17 : vector<8x4x1xi32> to vector<8x4xi32>
    %19 = vector.shape_cast %18 : vector<8x4xi32> to vector<8x4x1xi32>
    %20 = vector.broadcast %19 : vector<8x4x1xi32> to vector<8x4x16xi32>
    %21 = arith.cmpi eq, %20, %15 : vector<8x4x16xi32>
    %22 = vector.extract_strided_slice %2 {offsets = [0, 0, 0], sizes = [8, 4, 1], strides = [1, 1, 1]} : vector<8x4x4xf32> to vector<8x4x1xf32>
    %23 = vector.shape_cast %22 : vector<8x4x1xf32> to vector<8x4xf32>
    %24 = vector.shape_cast %23 : vector<8x4xf32> to vector<8x4x1xf32>
    %cst_22 = arith.constant 0.000000e+00 : f32
    %25 = vector.shape_cast %24 : vector<8x4x1xf32> to vector<8x4x1xf32>
    %26 = vector.broadcast %25 : vector<8x4x1xf32> to vector<8x4x16xf32>
    %27 = vector.broadcast %cst_22 : f32 to vector<8x4x16xf32>
    %28 = arith.select %21, %26, %27 : vector<8x4x16xi1>, vector<8x4x16xf32>
    %29 = arith.addf %16, %28 : vector<8x4x16xf32>
    %30 = vector.extract_strided_slice %1 {offsets = [0, 0, 1], sizes = [8, 4, 1], strides = [1, 1, 1]} : vector<8x4x4xi32> to vector<8x4x1xi32>
    %31 = vector.shape_cast %30 : vector<8x4x1xi32> to vector<8x4xi32>
    %32 = vector.shape_cast %31 : vector<8x4xi32> to vector<8x4x1xi32>
    %33 = vector.broadcast %32 : vector<8x4x1xi32> to vector<8x4x16xi32>
    %34 = arith.cmpi eq, %33, %15 : vector<8x4x16xi32>
    %35 = vector.extract_strided_slice %2 {offsets = [0, 0, 1], sizes = [8, 4, 1], strides = [1, 1, 1]} : vector<8x4x4xf32> to vector<8x4x1xf32>
    %36 = vector.shape_cast %35 : vector<8x4x1xf32> to vector<8x4xf32>
    %37 = vector.shape_cast %36 : vector<8x4xf32> to vector<8x4x1xf32>
    %cst_23 = arith.constant 0.000000e+00 : f32
    %38 = vector.shape_cast %37 : vector<8x4x1xf32> to vector<8x4x1xf32>
    %39 = vector.broadcast %38 : vector<8x4x1xf32> to vector<8x4x16xf32>
    %40 = vector.broadcast %cst_23 : f32 to vector<8x4x16xf32>
    %41 = arith.select %34, %39, %40 : vector<8x4x16xi1>, vector<8x4x16xf32>
    %42 = arith.addf %29, %41 : vector<8x4x16xf32>
    %43 = vector.extract_strided_slice %1 {offsets = [0, 0, 2], sizes = [8, 4, 1], strides = [1, 1, 1]} : vector<8x4x4xi32> to vector<8x4x1xi32>
    %44 = vector.shape_cast %43 : vector<8x4x1xi32> to vector<8x4xi32>
    %45 = vector.shape_cast %44 : vector<8x4xi32> to vector<8x4x1xi32>
    %46 = vector.broadcast %45 : vector<8x4x1xi32> to vector<8x4x16xi32>
    %47 = arith.cmpi eq, %46, %15 : vector<8x4x16xi32>
    %48 = vector.extract_strided_slice %2 {offsets = [0, 0, 2], sizes = [8, 4, 1], strides = [1, 1, 1]} : vector<8x4x4xf32> to vector<8x4x1xf32>
    %49 = vector.shape_cast %48 : vector<8x4x1xf32> to vector<8x4xf32>
    %50 = vector.shape_cast %49 : vector<8x4xf32> to vector<8x4x1xf32>
    %cst_24 = arith.constant 0.000000e+00 : f32
    %51 = vector.shape_cast %50 : vector<8x4x1xf32> to vector<8x4x1xf32>
    %52 = vector.broadcast %51 : vector<8x4x1xf32> to vector<8x4x16xf32>
    %53 = vector.broadcast %cst_24 : f32 to vector<8x4x16xf32>
    %54 = arith.select %47, %52, %53 : vector<8x4x16xi1>, vector<8x4x16xf32>
    %55 = arith.addf %42, %54 : vector<8x4x16xf32>
    %56 = vector.extract_strided_slice %1 {offsets = [0, 0, 3], sizes = [8, 4, 1], strides = [1, 1, 1]} : vector<8x4x4xi32> to vector<8x4x1xi32>
    %57 = vector.shape_cast %56 : vector<8x4x1xi32> to vector<8x4xi32>
    %58 = vector.shape_cast %57 : vector<8x4xi32> to vector<8x4x1xi32>
    %59 = vector.broadcast %58 : vector<8x4x1xi32> to vector<8x4x16xi32>
    %60 = arith.cmpi eq, %59, %15 : vector<8x4x16xi32>
    %61 = vector.extract_strided_slice %2 {offsets = [0, 0, 3], sizes = [8, 4, 1], strides = [1, 1, 1]} : vector<8x4x4xf32> to vector<8x4x1xf32>
    %62 = vector.shape_cast %61 : vector<8x4x1xf32> to vector<8x4xf32>
    %63 = vector.shape_cast %62 : vector<8x4xf32> to vector<8x4x1xf32>
    %cst_25 = arith.constant 0.000000e+00 : f32
    %64 = vector.shape_cast %63 : vector<8x4x1xf32> to vector<8x4x1xf32>
    %65 = vector.broadcast %64 : vector<8x4x1xf32> to vector<8x4x16xf32>
    %66 = vector.broadcast %cst_25 : f32 to vector<8x4x16xf32>
    %67 = arith.select %60, %65, %66 : vector<8x4x16xi1>, vector<8x4x16xf32>
    %68 = arith.addf %55, %67 : vector<8x4x16xf32>
    %69 = arith.truncf %14 : vector<8x32xf32> to vector<8x32xbf16>
    %70 = vector.shape_cast %69 : vector<8x32xbf16> to vector<8x32x1xbf16>
    "tpu.trace_start"() <{level = 10 : i32, message = "bsh,bhx->bsx"}> : () -> ()
    %cst_26 = arith.constant dense<0.000000e+00> : vector<8x16x1xf32>
    %71 = tpu.matmul %3, %70, %cst_26 {dimension_numbers = #tpu.dot_dimension_numbers<[2], [1], [1], [2], [0, 0, 0, 1, 1, 2], [0], [0]>} : vector<8x16x32xbf16>, vector<8x32x1xbf16>, vector<8x16x1xf32> -> vector<8x16x1xf32>
    "tpu.trace_stop"() : () -> ()
    %72 = vector.shape_cast %71 : vector<8x16x1xf32> to vector<8x16xf32>
    %73 = vector.shape_cast %72 : vector<8x16xf32> to vector<8x1x16xf32>
    %74 = vector.broadcast %73 : vector<8x1x16xf32> to vector<8x4x16xf32>
    %75 = arith.mulf %68, %74 : vector<8x4x16xf32>
    %cst_27 = arith.constant dense<0.000000e+00> : vector<8x4xf32>
    %76 = vector.multi_reduction <add>, %75, %cst_27 [2] : vector<8x4x16xf32> to vector<8x4xf32>
    %cst_28 = arith.constant 0.000000e+00 : f32
    %77 = vector.broadcast %cst_28 : f32 to vector<8x124xf32>
    %78 = tpu.concatenate %76, %77 in 1 : vector<8x4xf32>, vector<8x124xf32> -> vector<8x128xf32>
    %c0_29 = arith.constant 0 : index
    %c0_30 = arith.constant 0 : index
    %79 = vector.load %arg10[%c0_29, %c0_30] : memref<8x128xf32, #tpu.memory_space<vmem>>, vector<8x128xf32>
    tpu.vector_store %arg10[%c0_29, %c0_30], %78 {strides = array<i32>} : memref<8x128xf32, #tpu.memory_space<vmem>>, vector<8x128xf32>,
    return
  }
  func.func @transform_0(%arg0: i32) -> (i32, i32) {
    %c0_i32 = arith.constant 0 : i32
    %c0_i32_0 = arith.constant 0 : i32
    return %arg0, %c0_i32 : i32, i32
  }
  func.func @transform_1(%arg0: i32) -> (i32, i32, i32) {
    %c0_i32 = arith.constant 0 : i32
    %c0_i32_0 = arith.constant 0 : i32
    %c0_i32_1 = arith.constant 0 : i32
    return %arg0, %c0_i32, %c0_i32_0 : i32, i32, i32
  }
  func.func @transform_2(%arg0: i32) -> (i32, i32, i32) {
    %c0_i32 = arith.constant 0 : i32
    %c0_i32_0 = arith.constant 0 : i32
    %c0_i32_1 = arith.constant 0 : i32
    return %arg0, %c0_i32, %c0_i32_0 : i32, i32, i32
  }
  func.func @transform_3(%arg0: i32) -> (i32, i32, i32) {
    %c0_i32 = arith.constant 0 : i32
    %c0_i32_0 = arith.constant 0 : i32
    %c0_i32_1 = arith.constant 0 : i32
    return %arg0, %c0_i32, %c0_i32_0 : i32, i32, i32
  }
  func.func @transform_4(%arg0: i32) -> (i32, i32) {
    %c0_i32 = arith.constant 0 : i32
    %c0_i32_0 = arith.constant 0 : i32
    %c0_i32_1 = arith.constant 0 : i32
    return %c0_i32, %c0_i32_0 : i32, i32
  }
  func.func @transform_5(%arg0: i32) -> (i32, i32) {
    %c0_i32 = arith.constant 0 : i32
    %c0_i32_0 = arith.constant 0 : i32
    %c0_i32_1 = arith.constant 0 : i32
    return %c0_i32, %c0_i32_0 : i32, i32
  }
  func.func @transform_6(%arg0: i32) -> (i32, i32) {
    %c0_i32 = arith.constant 0 : i32
    %c0_i32_0 = arith.constant 0 : i32
    %c0_i32_1 = arith.constant 0 : i32
    return %c0_i32, %c0_i32_0 : i32, i32
  }
  func.func @transform_7(%arg0: i32) -> (i32, i32) {
    %c0_i32 = arith.constant 0 : i32
    %c0_i32_0 = arith.constant 0 : i32
    %c0_i32_1 = arith.constant 0 : i32
    return %c0_i32, %c0_i32_0 : i32, i32
  }
  func.func @transform_8(%arg0: i32) -> (i32, i32) {
    %c0_i32 = arith.constant 0 : i32
    %c0_i32_0 = arith.constant 0 : i32
    return %arg0, %c0_i32 : i32, i32
  }
  func.func @transform_9(%arg0: i32) -> (i32, i32) {
    %c0_i32 = arith.constant 0 : i32
    %c0_i32_0 = arith.constant 0 : i32
    return %arg0, %c0_i32 : i32, i32
  }
}

</mosaic_0001>

<bundles_post_ra>
// kernel: tpu_custom_call.1
= control target key start
LH: loop header
LB: loop body
LE: loop exit
PB: predicated region body
PF: predicated region fallthrough
CT: control target
= control target key end

     0   :  { %15 = vsyncpa [#allocation3], 0  ;;  %s2826_s0 = inlined_call_operand.hbm [shape: bf16[16,32], index: 0, kind: input, shape index: {}]   ;;  %s2827_s1 = inlined_call_operand.vmem [shape: bf16[16,16,32], index: 1, kind: input, shape index: {}]   ;;  %s2828_s2 = inlined_call_operand.vmem [shape: s32[16,4,4], index: 2, kind: input, shape index: {}]   ;;  %s2829_s3 = inlined_call_operand.vmem [shape: f32[16,4,4], index: 3, kind: input, shape index: {}]   ;;  %s2830_s4 = inlined_call_operand.vmem [shape: bf16[32,128], index: 4, kind: input, shape index: {}]   ;;  %s2831_s5 = inlined_call_operand.vmem [shape: f32[1,128], index: 5, kind: input, shape index: {}]   ;;  %s2832_s6 = inlined_call_operand.vmem [shape: bf16[32,32], index: 6, kind: input, shape index: {}]   ;;  %s2833_s7 = inlined_call_operand.vmem [shape: f32[1,32], index: 7, kind: input, shape index: {}]   ;;  %s2834_s8 = inlined_call_operand.hbm [shape: f32[16,128], index: 8, kind: output, shape index: {0}]   ;;  %s2835_s9 = inlined_call_operand.hbm [shape: f32[16,128], index: 9, kind: output, shape index: {1}]  }
   0x1   :  { %17 = vsyncpa [#allocation3 + $0x1], 0 }
   0x2   :  { %18 = vsyncpa [#allocation4], 0 }
   0x3   :  { %20 = vsyncpa [#allocation4 + $0x1], 0 }
   0x4   :  { %21 = vsyncpa [#allocation7], 0 }
   0x5   :  { %23 = vsyncpa [#allocation7 + $0x1], 0  ;;  %s2257_s30 = smov 0   ;;  %s2259_s10 = smov 0  }
   0x6   :  { %s2261_s11 = smov 0   ;;  %s2263_s12 = smov 0  }
   0x7 LB: > { %s2278_s13 = sadd.s32 4294967295, %s2196_s12   ;;  %s1833_s14 = sadd.s32 4294967294, %s2196_s12   ;;  %s2196_s12 = sphi %s2263_s12, %s2854_s12   ;;  %s2192_s11 = sphi %s2261_s11, %s2853_s11   ;;  %s2188_s10 = sphi %s2259_s10, %s2852_s10   ;;  %s2184_s30 = sphi %s2257_s30, %s2851_s30  }
   0x8   : > { %s2282_s15 = sadd.s32 1, %s2196_s12   ;;  %s36_s16 = sadd.s32 1, %s2192_s11 }
   0x9   : > { %s33_s17 = ssub.s32 %s2196_s12, %s2282_s15  ;;  %p43_p0 = scmp.ne.s32.totalorder %s2192_s11, %s2188_s10 }
   0xa   : > { %p34_p1 = scmp.eq.s32.totalorder %s33_s17, 0  ;;  %p44_p2 = scmp.eq.s32.totalorder %s2196_s12, 0 }
   0xb   : > { %p49_p3 = scmp.ne.s32.totalorder %s2188_s10, %s2184_s30  ;;  %p50_p4 = scmp.eq.s32.totalorder %s2278_s13, 0 }
   0xc   : > { %s2294_s18 = scalar_select %p34_p1, %s2192_s11, %s36_s16  }
   0xd   : > { %p2296_p5 = por %p44_p2, %p43_p0  ;;  %p2300_p6 = por %p50_p4, %p49_p3 }
   0xe   : > { %p235_p7 = scmp.eq.s32.totalorder %s2278_s13, 1  ;;  %p241_p8 = scmp.eq.s32.totalorder %s1833_s14, 1 }
   0xf   : > { %p2007_p10 = scmp.lt.s32.totalorder %s2196_s12, 2  ;;  %s299_s23 = sand.u32 1, %s2192_s11  }
  0x10   : > { %p2307_p11 = por %p235_p7, %p43_p0  ;;  %p2311_p12 = por %p241_p8, %p49_p3 }
  0x11   : > { %s1837_s24 = sshll.u32 %s2196_s12, 6  ;;  %s1836_s25 = sshll.u32 %s299_s23, 2 }
  0x12   : > { %s2841_s21 = scalar_select %p2307_p11, 1, 0 }
  0x13   : > { %s2842_s22 = scalar_select %p2311_p12, 1, 0 }
  0x14   : > { %s2320_s28 = scalar_lea.hbm %s2826_s0, %s1837_s24  ;;  %s303_s29 = scalar_lea.vmem [#allocation2], %s1836_s25 }
  0x15   : > { %s310_s14 = sshll.u32 %s303_s29, 4  ;;  %p2324_p13 = pnand %p2007_p10, %p2296_p5  ;;  %s2328_s14 = int_to_ptr.vmem [resolvable:$true] %s310_s14 }
  0x16   : > { %s300_s17 = scalar_lea.sflag [#allocation3], %s299_s23  ;;  %s2068_s24 = scalar_lea.hbm %s2320_s28, 64 }
  0x17   : > { %p2069_p2 = scmp.ne.s32.totalorder %s2320_s28, %s2068_s24  ;;  %p2070_p3 = pneg %p2324_p13 }
  0x18   : > { %s2073_s26 = scalar_lea.hbm %s2826_s0, 128  ;;  %p2074_p5 = scmp.lt.u32.totalorder %s2320_s28, %s2826_s0 }
  0x19   : > { %p2071_p4 = pnand %p2070_p3, %p2069_p2  ;;  %p2075_p8 = scmp.lt.u32.totalorder %s2073_s26, %s2068_s24 }
  0x1a   : > { %p2077_p9 = scmp.lt.u32.totalorder %s2068_s24, %s2320_s28 }
  0x1b   : > { %p2072_p7 = pneg %p2071_p4  ;;  %p2076_p10 = por %p2075_p8, %p2074_p5 }
  0x1d   : > { %p2078_p0 = por %p2077_p9, %p2076_p10 }
  0x1f   : > { %p2079_p1 = pnand %p2078_p0, %p2072_p7 }
  0x21   : > { %2082 = shalt.err (!%p2079_p1)
}
  0x22   : > { %s2083_s23 = scalar_lea.vmem %s2328_s14, 64  ;;  %s2198_s19 = smov [#allocation2]  }
  0x23   : > { %p2084_p2 = scmp.ne.s32.totalorder %s2328_s14, %s2083_s23  ;;  %s2088_s25 = sshll.u32 %s2198_s19, 4  ;;  %s2089_s25 = int_to_ptr.vmem [resolvable:$false] %s2088_s25 }
  0x24   : > { %s2090_s27 = scalar_lea.vmem %s2089_s25, 128  ;;  %p2091_p11 = scmp.lt.s32.totalorder %s2328_s14, %s2089_s25 }
  0x25   : > { %p2086_p4 = pnand %p2084_p2, %p2070_p3  ;;  %p2092_p5 = scmp.lt.s32.totalorder %s2090_s27, %s2083_s23 }
  0x27   : > { %p2087_p12 = pneg %p2086_p4  ;;  %p2093_p8 = por %p2092_p5, %p2091_p11 }
  0x29   : > { %p2094_p9 = pnand %p2093_p8, %p2087_p12 }
  0x2b   : > { %2097 = shalt.err (!%p2094_p9)
}
  0x2c   : > { %1999 = dma.hbm_to_vmem [thread:$0]  (!%p2324_p13), %s2320_s28, 64, %s2328_s14, %s300_s17  }
  0x2d   : > { %p2844_p0 = scmp.lt.s32.totalorder %s2196_s12, 3  ;;  %p2845_p1 = scmp.ge.s32.totalorder %s2196_s12, 1 }
  0x2f   : > { %p344_p3 = pnand %p2845_p1, %p2844_p0 }
  0x30   : > { %s2362_s24 = sand.u32 (!%p344_p3), 1, %s2188_s10  }
  0x31   : > { %347 = sbr.rel (%p344_p3) target bundleno = 947 (0x3b3), region = 52  ;;  %s1839_s26 = sshll.u32 (!%p344_p3), %s2362_s24, 2 }
  0x32   : > { %s350_s29 = scalar_lea.sflag (!%p344_p3), [#allocation3], %s2362_s24  ;;  %s353_s23 = scalar_lea.vmem (!%p344_p3), [#allocation2], %s1839_s26 }
  0x38   : > { %2171 = dma.done.wait (%p2300_p6), %s350_s29, 64  }
  0x39   : > { %2173 = vsyncadd (%p2300_p6), %s350_s29, 4294967232  ;;  %v2199_v0 = vmov 0.0   ;;  %vm2200_vm0 = vmmov 0   ;;  %v2056_v1 = vld [vmem:[%s2832_s6] sm:$0xff]   ;;  %v2057_v2 = vld [vmem:[%s2832_s6 + $0x8] sm:$0xff]   ;;  %vm485_vm1 = vcmask 261120   ;;  %v593_v8 = vlaneseq }
  0x3a   : > { %1918 = vmatprep.subr.bf16.mxu1 %v2199_v0  ;;  %1922 = vmatprep.mubr.msk.bf16.mxu1 %vm2200_vm0, %v2199_v0  ;;  %v429_v3 = vld [vmem:[%s353_s23] sm:$0xf]  ;;  %s1842_s17 = sshll.u32 %s2278_s13, 3  ;;  %v2201_v4 = vmov 0   ;;  %v2202_v5 = vmov 1   ;;  %v2059_v7 = vld [vmem:[%s2830_s4 + $0x8] sm:$0xff]  }
  0x3b   : > { %1910 = vmatprep.subr.bf16.mxu0 %v2199_v0  ;;  %1914 = vmatprep.mubr.msk.bf16.mxu0 %vm2200_vm0, %v2199_v0  ;;  %p410_p6 = scmp.lt.s32.totalorder %s1842_s17, 15  ;;  %v2058_v6 = vld [vmem:[%s2830_s4] sm:$0xff]   ;;  %v2413_v10 = vshrl.u32 %v593_v8, 7  ;;  %v2203_v41 = vmov 2   ;;  %v2204_v49 = vmov 3   ;;  %s1664_s23 = scalar_lea.sflag [#allocation4], %s2362_s24 }
  0x3c   : > { %1919 = vmatpush3.bf16.msra.mxu1 %v2056_v1  ;;  %2047 = vset.pattern.permute.xlu1 %v2201_v4  ;;  %v1853_v9 = vld [vmem:[%s2833_s7] ss:$0 sm:$0xff]  ;;  %p2846_p12 = scmp.ne.s32.totalorder %s2841_s21, 0  ;;  %s2205_s14 = smov [#allocation5]  }
  0x3d   : > { %1920 = vmatprep.subr.bf16.mxu1 %v2199_v0  ;;  %s2856_s17 = smov (!%p410_p6, %s1842_s17), 15  ;;  %2049 = vset.pattern.permute.xlu0 %v2202_v5  ;;  %v929_v17 = vsub.s32 0, %v2413_v10  ;;  %v954_v23 = vsub.s32 1, %v2413_v10  ;;  %v976_v26 = vsub.s32 2, %v2413_v10  ;;  %v998_v29 = vsub.s32 3, %v2413_v10  ;;  %s2102_s20 = sshll.u32 %s2205_s14, 4  ;;  %s2103_s20 = int_to_ptr.vmem [resolvable:$false] %s2102_s20 }
  0x3e   : > { %s1879_s19 = sshll.u32 %s2856_s17, 3  ;;  %1911 = vmatpush3.bf16.msra.mxu0 %v2058_v6 }
  0x3f   : > { %s2395_s26 = scalar_lea.vmem %s2827_s1, %s1879_s19  ;;  %1912 = vmatprep.subr.bf16.mxu0 %v2199_v0  ;;  %s1846_s19 = sshll.u32 %s2856_s17, 2 }
  0x40   : > { %1921 = vmatpush3.bf16.msra.mxu1 %v2057_v2  ;;  %s2423_s29 = scalar_lea.vmem %s2828_s2, %s1846_s19  ;;  %s2441_s28 = scalar_lea.vmem %s2829_s3, %s1846_s19  ;;  %v2060_v54 = vld [vmem:[%s2395_s26] sm:$0xff]   ;;  %v2061_v57 = vld [vmem:[%s2395_s26 + $0x8] sm:$0xff]   ;;  %v2062_v60 = vld [vmem:[%s2395_s26 + $0x10] sm:$0xff]  }
  0x41   : > { %1934 = vmatprep.subr.bf16.mxu1 %v2199_v0  ;;  %v431_v32 = vld [vmem:[%s2423_s29 + $0x4] sm:$0xf]  ;;  %v2427_v33 = vld [vmem:[%s2423_s29 + $0x8] sm:$0xf]  ;;  %v2430_v34 = vld [vmem:[%s2423_s29 + $0x10] sm:$0xf] }
  0x42   : > { %1913 = vmatpush3.bf16.msra.mxu0 %v2059_v7  ;;  %v2435_v35 = vld [vmem:[%s2423_s29 + $0x18] sm:$0xf]  ;;  %v2445_v36 = vld [vmem:[%s2441_s28] sm:$0xf]  ;;  %v2450_v37 = vld [vmem:[%s2441_s28 + $0x8] sm:$0xf] }
  0x43   : > { %1923 = vmatmul.mubr.msk.bf16.vlgmr.msra.gmra.mrb[0].mxu1 %vm485_vm1, %v429_v3  ;;  %1926 = vmatprep.subr.bf16.mxu0 %v2199_v0  ;;  %v2455_v38 = vld [vmem:[%s2441_s28 + $0x10] sm:$0xf]  ;;  %v2460_v39 = vld [vmem:[%s2441_s28 + $0x18] sm:$0xf]  ;;  %v2466_v40 = vld [vmem:[%s2423_s29] sm:$0xf] }
  0x44   : > { %1938 = vmatprep.mubr.msk.bf16.mxu1 %vm2200_vm0, %v2199_v0  ;;  %v433_v42 = vld [vmem:[%s2423_s29 + $0xc] sm:$0xf]  ;;  %v435_v43 = vld [vmem:[%s2423_s29 + $0x14] sm:$0xf]  ;;  %v2475_v44 = vld [vmem:[%s2423_s29 + $0x1c] sm:$0xf] }
  0x45   : > { %1915 = vmatmul.mubr.msk.bf16.vlgmr.msra.gmra.mrb[0].mxu0 %vm485_vm1, %v429_v3  ;;  %v2479_v45 = vld [vmem:[%s2441_s28 + $0x4] sm:$0xf]  ;;  %v2483_v46 = vld [vmem:[%s2441_s28 + $0xc] sm:$0xf]  ;;  %v2488_v47 = vld [vmem:[%s2441_s28 + $0x14] sm:$0xf] }
  0x46   : > { %1930 = vmatprep.mubr.msk.bf16.mxu0 %vm2200_vm0, %v2199_v0  ;;  %v2493_v48 = vld [vmem:[%s2441_s28 + $0x1c] sm:$0xf]  ;;  %v2064_v3 = vld [vmem:[%s2395_s26 + $0x20] sm:$0xff]   ;;  %v2065_v6 = vld [vmem:[%s2395_s26 + $0x28] sm:$0xff]   ;;  %s2838_s19 = sshll.u32 %s2278_s13, 7 }
  0x47   : > { %v2063_v63 = vld [vmem:[%s2395_s26 + $0x18] sm:$0xff]   ;;  %s2746_s29 = scalar_lea.hbm %s2834_s8, %s2838_s19 }
 0x116   : > { %v587_v11 = vpop.f32.mrb[0].mxu1 }
 0x117   : > { %v588_v12 = vadd.f32 %v1853_v9, %v587_v11  ;;  %v1924_v13 = vpop.f32.mrb[1].mxu1  ;;  %v2066_v11 = vld [vmem:[%s2395_s26 + $0x30] sm:$0xff]  }
 0x118   : > { %v590_v14 = vpop.f32.mrb[2].mxu1  ;;  %v2067_v13 = vld [vmem:[%s2395_s26 + $0x38] sm:$0xff]   ;;  %s2837_s26 = sshll.u32 %s2362_s24, 3 }
 0x119   : > { %v923_v15 = vpack.c.bf16 %v588_v12, %v588_v12  ;;  %v1925_v16 = vpop.f32.mrb[3].mxu1  ;;  %v2565_v14 = vand.u32 127, %v593_v8  ;;  %s2594_s16 = scalar_lea.vmem [#allocation5], %s2837_s26  ;;  %s2104_s26 = scalar_lea.vmem %s2103_s20, 256 }
 0x11a   : > { %s1682_s17 = sshll.u32 %s2594_s16, 4  ;;  %s1683_s17 = int_to_ptr.vmem [resolvable:$true] %s1682_s17 }
 0x11b   : > { %v925_v18 = vpack.i.b16 %v923_v15, %v923_v15  ;;  %v938_v19 = vshrl.u32 %v923_v15, 16  ;;  %s2098_s28 = scalar_lea.vmem %s1683_s17, 128  ;;  %p2105_p10 = scmp.lt.s32.totalorder %s1683_s17, %s2103_s20 }
 0x11c   : > { %p2099_p11 = scmp.ne.s32.totalorder %s1683_s17, %s2098_s28  ;;  %p2106_p2 = scmp.lt.s32.totalorder %s2104_s26, %s2098_s28 }
 0x11d   : > { %v939_v20 = vpack.i.b16 %v938_v19, %v938_v19  ;;  %v930_v21 = vrot.slane %v925_v18, %v929_v17  ;;  %v955_v25 = vrot.slane %v925_v18, %v954_v23  ;;  %v977_v28 = vrot.slane %v925_v18, %v976_v26 }
 0x11e   : > { %v999_v31 = vrot.slane %v925_v18, %v998_v29  ;;  %p2100_p13 = pnand %p2099_p11, %p2846_p12  ;;  %p2107_p4 = por %p2106_p2, %p2105_p10 }
 0x11f   : > { %936 = vbcast.lane.c.b16.xlu1 %v930_v21, 272  ;;  %932 = vbcast.lane.c.b16.xlu0 %v930_v21, 256  ;;  %v944_v22 = vrot.slane %v939_v20, %v929_v17  ;;  %v966_v24 = vrot.slane %v939_v20, %v954_v23  ;;  %v988_v27 = vrot.slane %v939_v20, %v976_v26  ;;  %v1849_v21 = vld [vmem:[%s2831_s5] ss:$0 sm:$0xff] }
 0x120   : > { %v1010_v30 = vrot.slane %v939_v20, %v998_v29  ;;  %p2101_p7 = pneg %p2100_p13 }
 0x122   : > { %p2108_p5 = pnand %p2107_p4, %p2101_p7 }
 0x123   : > { %950 = vbcast.lane.c.b16.xlu1 %v944_v22, 272  ;;  %946 = vbcast.lane.c.b16.xlu0 %v944_v22, 256  ;;  %v523_v22 = vpop.f32.mrb[0].mxu0 }
 0x124   : > { %v1916_v26 = vpop.f32.mrb[1].mxu0 }
 0x127   : > { %968 = vbcast.lane.c.b16.xlu1 %v966_v24, 256  ;;  %957 = vbcast.lane.c.b16.xlu0 %v955_v25, 256 }
 0x12b   : > { %972 = vbcast.lane.c.b16.xlu1 %v966_v24, 272  ;;  %961 = vbcast.lane.c.b16.xlu0 %v955_v25, 272  ;;  %v524_v25 = vadd.f32 %v1849_v21, %v523_v22 }
 0x12d   : > { %529 = vst [vmem:[%s2594_s16] sm:$0xff] %v524_v25 }
 0x12f   : > { %990 = vbcast.lane.c.b16.xlu1 %v988_v27, 256  ;;  %979 = vbcast.lane.c.b16.xlu0 %v977_v28, 256 }
 0x133   : > { %994 = vbcast.lane.c.b16.xlu1 %v988_v27, 272  ;;  %983 = vbcast.lane.c.b16.xlu0 %v977_v28, 272  ;;  %v526_v27 = vpop.f32.mrb[2].mxu0 }
 0x134   : > { %v1917_v28 = vpop.f32.mrb[3].mxu0 }
 0x137   : > { %1012 = vbcast.lane.c.b16.xlu1 %v1010_v30, 256  ;;  %1001 = vbcast.lane.c.b16.xlu0 %v999_v31, 256 }
 0x13b   : > { %1016 = vbcast.lane.c.b16.xlu1 %v1010_v30, 272  ;;  %1005 = vbcast.lane.c.b16.xlu0 %v999_v31, 272 }
 0x13f   : > { %599 = vperm.xlu1 %2047, %v431_v32   ;;  %687 = vperm.xlu0 %2049, %v431_v32  }
 0x143   : > { %602 = vperm.xlu1 %2047, %v2427_v33   ;;  %696 = vperm.xlu0 %2049, %v2430_v34  }
 0x147   : > { %608 = vperm.xlu1 %2047, %v2430_v34   ;;  %702 = vperm.xlu0 %2049, %v2435_v35  }
 0x14b   : > { %614 = vperm.xlu1 %2047, %v2435_v35   ;;  %716 = vperm.xlu0 %2049, %v2445_v36  }
 0x14f   : > { %629 = vperm.xlu1 %2047, %v2445_v36   ;;  %724 = vperm.xlu0 %2049, %v2450_v37  }
 0x153   : > { %639 = vperm.xlu1 %2047, %v2450_v37   ;;  %732 = vperm.xlu0 %2049, %v2455_v38  }
 0x157   : > { %649 = vperm.xlu1 %2047, %v2455_v38   ;;  %740 = vperm.xlu0 %2049, %v2460_v39  }
 0x15b   : > { %659 = vperm.xlu1 %2047, %v2460_v39   ;;  %2050 = vset.pattern.permute.xlu0 %v2203_v41 }
 0x15c   : > { %764 = vperm.xlu0 %2050, %v2466_v40  }
 0x15f   : > { %2048 = vset.pattern.permute.xlu1 %v2202_v5 }
 0x160   : > { %684 = vperm.xlu1 %2048, %v2466_v40   ;;  %773 = vperm.xlu0 %2050, %v433_v42  }
 0x164   : > { %690 = vperm.xlu1 %2048, %v2427_v33   ;;  %779 = vperm.xlu0 %2050, %v435_v43  }
 0x168   : > { %693 = vperm.xlu1 %2048, %v433_v42   ;;  %785 = vperm.xlu0 %2050, %v2475_v44  }
 0x16c   : > { %699 = vperm.xlu1 %2048, %v435_v43   ;;  %800 = vperm.xlu0 %2050, %v2479_v45  }
 0x170   : > { %705 = vperm.xlu1 %2048, %v2475_v44   ;;  %808 = vperm.xlu0 %2050, %v2483_v46  }
 0x174   : > { %720 = vperm.xlu1 %2048, %v2479_v45   ;;  %816 = vperm.xlu0 %2050, %v2488_v47  }
 0x178   : > { %728 = vperm.xlu1 %2048, %v2483_v46   ;;  %824 = vperm.xlu0 %2050, %v2493_v48  }
 0x17c   : > { %736 = vperm.xlu1 %2048, %v2488_v47   ;;  %2053 = vset.pattern.permute.xlu0 %v2204_v49 }
 0x17d   : > { %847 = vperm.xlu0 %2053, %v431_v32  }
 0x180   : > { %744 = vperm.xlu1 %2048, %v2493_v48  }
 0x181   : > { %880 = vperm.xlu0 %2053, %v2479_v45  }
 0x184   : > { %2051 = vset.pattern.permute.xlu1 %v2203_v41 }
 0x185   : > { %767 = vperm.xlu1 %2051, %v431_v32   ;;  %853 = vperm.xlu0 %2053, %v433_v42  }
 0x189   : > { %770 = vperm.xlu1 %2051, %v2427_v33   ;;  %859 = vperm.xlu0 %2053, %v435_v43  }
 0x18d   : > { %776 = vperm.xlu1 %2051, %v2430_v34   ;;  %865 = vperm.xlu0 %2053, %v2475_v44  }
 0x191   : > { %v937_v50 = vpop.permute.xlu1 %936  ;;  %v933_v51 = vpop.permute.xlu0 %932  ;;  %782 = vperm.xlu1 %2051, %v2435_v35   ;;  %2054 = vset.pattern.permute.xlu0 %v2201_v4 }
 0x192   : > { %1927 = vmatpush3.bf16.msra.mxu0 %v933_v51  ;;  %596 = vperm.xlu0 %2054, %v2466_v40  }
 0x193   : > { %1928 = vmatprep.subr.bf16.mxu0 %v2199_v0 }
 0x195   : > { %v951_v52 = vpop.permute.xlu1 %950  ;;  %v947_v53 = vpop.permute.xlu0 %946  ;;  %796 = vperm.xlu1 %2051, %v2445_v36  }
 0x196   : > { %1929 = vmatpush3.bf16.msra.mxu0 %v937_v50  ;;  %1935 = vmatpush3.bf16.msra.mxu1 %v947_v53 }
 0x197   : > { %1936 = vmatprep.subr.bf16.mxu1 %v2199_v0  ;;  %1942 = vmatprep.subr.bf16.mxu0 %v2199_v0 }
 0x198   : > { %605 = vperm.xlu0 %2054, %v433_v42  }
 0x199   : > { %v969_v55 = vpop.permute.xlu1 %968  ;;  %v958_v56 = vpop.permute.xlu0 %957  ;;  %1931 = vmatmul.mubr.msk.bf16.vlgmr.msra.gmra.mrb[4].mxu0 %vm485_vm1, %v2060_v54  ;;  %804 = vperm.xlu1 %2051, %v2450_v37  }
 0x19a   : > { %1937 = vmatpush3.bf16.msra.mxu1 %v951_v52  ;;  %1943 = vmatpush3.bf16.msra.mxu0 %v958_v56 }
 0x19b   : > { %1950 = vmatprep.subr.bf16.mxu1 %v2199_v0  ;;  %1944 = vmatprep.subr.bf16.mxu0 %v2199_v0 }
 0x19c   : > { %1946 = vmatprep.mubr.msk.bf16.mxu0 %vm2200_vm0, %v2199_v0  ;;  %611 = vperm.xlu0 %2054, %v435_v43  }
 0x19d   : > { %v973_v58 = vpop.permute.xlu1 %972  ;;  %1939 = vmatmul.mubr.msk.bf16.vlgmr.msra.gmra.mrb[4].mxu1 %vm485_vm1, %v2061_v57  ;;  %v962_v59 = vpop.permute.xlu0 %961  ;;  %812 = vperm.xlu1 %2051, %v2455_v38  }
 0x19e   : > { %1945 = vmatpush3.bf16.msra.mxu0 %v962_v59  ;;  %1951 = vmatpush3.bf16.msra.mxu1 %v969_v55 }
 0x19f   : > { %1952 = vmatprep.subr.bf16.mxu1 %v2199_v0  ;;  %1958 = vmatprep.subr.bf16.mxu0 %v2199_v0 }
 0x1a0   : > { %1954 = vmatprep.mubr.msk.bf16.mxu1 %vm2200_vm0, %v2199_v0  ;;  %617 = vperm.xlu0 %2054, %v2475_v44  }
 0x1a1   : > { %v991_v61 = vpop.permute.xlu1 %990  ;;  %v980_v62 = vpop.permute.xlu0 %979  ;;  %1947 = vmatmul.mubr.msk.bf16.vlgmr.msra.gmra.mrb[8].mxu0 %vm485_vm1, %v2062_v60  ;;  %820 = vperm.xlu1 %2051, %v2460_v39  }
 0x1a2   : > { %1953 = vmatpush3.bf16.msra.mxu1 %v973_v58  ;;  %1959 = vmatpush3.bf16.msra.mxu0 %v980_v62 }
 0x1a3   : > { %1966 = vmatprep.subr.bf16.mxu1 %v2199_v0  ;;  %1960 = vmatprep.subr.bf16.mxu0 %v2199_v0 }
 0x1a4   : > { %1962 = vmatprep.mubr.msk.bf16.mxu0 %vm2200_vm0, %v2199_v0  ;;  %634 = vperm.xlu0 %2054, %v2479_v45  }
 0x1a5   : > { %v995_v1 = vpop.permute.xlu1 %994  ;;  %1955 = vmatmul.mubr.msk.bf16.vlgmr.msra.gmra.mrb[8].mxu1 %vm485_vm1, %v2063_v63  ;;  %v984_v2 = vpop.permute.xlu0 %983  ;;  %2052 = vset.pattern.permute.xlu1 %v2204_v49 }
 0x1a6   : > { %1961 = vmatpush3.bf16.msra.mxu0 %v984_v2  ;;  %1967 = vmatpush3.bf16.msra.mxu1 %v991_v61 }
 0x1a7   : > { %1968 = vmatprep.subr.bf16.mxu1 %v2199_v0  ;;  %1974 = vmatprep.subr.bf16.mxu0 %v2199_v0 }
 0x1a8   : > { %1970 = vmatprep.mubr.msk.bf16.mxu1 %vm2200_vm0, %v2199_v0  ;;  %844 = vperm.xlu1 %2052, %v2466_v40  }
 0x1a9   : > { %v1002_v5 = vpop.permute.xlu0 %1001  ;;  %1963 = vmatmul.mubr.msk.bf16.vlgmr.msra.gmra.mrb[12].mxu0 %vm485_vm1, %v2064_v3  ;;  %644 = vperm.xlu0 %2054, %v2483_v46   ;;  %v1013_v7 = vpop.permute.xlu1 %1012 }
 0x1aa   : > { %1969 = vmatpush3.bf16.msra.mxu1 %v995_v1  ;;  %1975 = vmatpush3.bf16.msra.mxu0 %v1002_v5 }
 0x1ab   : > { %1982 = vmatprep.subr.bf16.mxu1 %v2199_v0  ;;  %1976 = vmatprep.subr.bf16.mxu0 %v2199_v0 }
 0x1ac   : > { %1978 = vmatprep.mubr.msk.bf16.mxu0 %vm2200_vm0, %v2199_v0  ;;  %850 = vperm.xlu1 %2052, %v2427_v33  }
 0x1ad   : > { %1971 = vmatmul.mubr.msk.bf16.vlgmr.msra.gmra.mrb[12].mxu1 %vm485_vm1, %v2065_v6  ;;  %v1006_v9 = vpop.permute.xlu0 %1005  ;;  %654 = vperm.xlu0 %2054, %v2488_v47   ;;  %v1017_v12 = vpop.permute.xlu1 %1016 }
 0x1ae   : > { %1977 = vmatpush3.bf16.msra.mxu0 %v1006_v9  ;;  %1983 = vmatpush3.bf16.msra.mxu1 %v1013_v7 }
 0x1af   : > { %1984 = vmatprep.subr.bf16.mxu1 %v2199_v0  ;;  %1986 = vmatprep.mubr.msk.bf16.mxu1 %vm2200_vm0, %v2199_v0 }
 0x1b0   : > { %876 = vperm.xlu1 %2052, %v2445_v36  }
 0x1b1   : > { %1979 = vmatmul.mubr.msk.bf16.vlgmr.msra.gmra.mrb[16].mxu0 %vm485_vm1, %v2066_v11  ;;  %664 = vperm.xlu0 %2054, %v2493_v48  }
 0x1b2   : > { %1985 = vmatpush3.bf16.msra.mxu1 %v1017_v12 }
 0x1b4   : > { %884 = vperm.xlu1 %2052, %v2450_v37  }
 0x1b5   : > { %1987 = vmatmul.mubr.msk.bf16.vlgmr.msra.gmra.mrb[16].mxu1 %vm485_vm1, %v2067_v13 }
 0x1b8   : > { %856 = vperm.xlu1 %2052, %v2430_v34  }
 0x1bc   : > { %888 = vperm.xlu1 %2052, %v2483_v46  }
 0x1be   : > { %v2568_v0 = vpop.permute.xlu1 %599  ;;  %v2570_v15 = vpop.permute.xlu0 %687 }
 0x1bf   : > { %vm620_vm2 = vcmp.eq.s32.totalorder %v2568_v0, %v2565_v14  ;;  %vm708_vm3 = vcmp.eq.s32.totalorder %v2570_v15, %v2565_v14 }
 0x1c0   : > { %892 = vperm.xlu1 %2052, %v2455_v38  }
 0x1c2   : > { %v603_v16 = vpop.permute.xlu1 %602  ;;  %v697_v17 = vpop.permute.xlu0 %696 }
 0x1c3   : > { %vm621_vm4 = vcmp.eq.s32.totalorder %v603_v16, %v2565_v14  ;;  %vm711_vm5 = vcmp.eq.s32.totalorder %v697_v17, %v2565_v14 }
 0x1c4   : > { %862 = vperm.xlu1 %2052, %v2435_v35  }
 0x1c6   : > { %v609_v8 = vpop.permute.xlu1 %608  ;;  %v703_v18 = vpop.permute.xlu0 %702 }
 0x1c7   : > { %vm623_vm6 = vcmp.eq.s32.totalorder %v609_v8, %v2565_v14  ;;  %vm713_vm7 = vcmp.eq.s32.totalorder %v703_v18, %v2565_v14 }
 0x1c8   : > { %896 = vperm.xlu1 %2052, %v2488_v47  }
 0x1ca   : > { %v615_v19 = vpop.permute.xlu1 %614  ;;  %v717_v20 = vpop.permute.xlu0 %716 }
 0x1cb   : > { %vm625_vm8 = vcmp.eq.s32.totalorder %v615_v19, %v2565_v14 }
 0x1cc   : > { %900 = vperm.xlu1 %2052, %v2460_v39  }
 0x1ce   : > { %v2589_v23 = vpop.permute.xlu1 %629  ;;  %v725_v24 = vpop.permute.xlu0 %724 }
 0x1d0   : > { %904 = vperm.xlu1 %2052, %v2493_v48  }
 0x1d2   : > { %v640_v29 = vpop.permute.xlu1 %639  ;;  %v733_v30 = vpop.permute.xlu0 %732 }
 0x1d3   : > { %v669_v31 = vsel %vm621_vm4, %v640_v29, 0.0  ;;  %v751_v32 = vsel %vm711_vm5, %v733_v30, 0.0 }
 0x1d4   : > { %2055 = vset.pattern.permute.xlu1 %v2201_v4 }
 0x1d6   : > { %v650_v33 = vpop.permute.xlu1 %649  ;;  %v741_v34 = vpop.permute.xlu0 %740 }
 0x1d7   : > { %v671_v35 = vsel %vm623_vm6, %v650_v33, 0.0  ;;  %v753_v36 = vsel %vm713_vm7, %v741_v34, 0.0 }
 0x1d8   : > { %v2606_v37 = vadd.f32 %v751_v32, %v671_v35 }
 0x1da   : > { %v660_v38 = vpop.permute.xlu1 %659 }
 0x1db   : > { %v673_v39 = vsel %vm625_vm8, %v660_v38, 0.0  ;;  %v765_v40 = vpop.permute.xlu0 %764 }
 0x1dc   : > { %v2610_v41 = vadd.f32 %v753_v36, %v673_v39  ;;  %vm787_vm9 = vcmp.eq.s32.totalorder %v765_v40, %v2565_v14 }
 0x1df   : > { %v685_v4 = vpop.permute.xlu1 %684  ;;  %v774_v42 = vpop.permute.xlu0 %773 }
 0x1e0   : > { %vm707_vm10 = vcmp.eq.s32.totalorder %v685_v4, %v2565_v14  ;;  %vm790_vm11 = vcmp.eq.s32.totalorder %v774_v42, %v2565_v14 }
 0x1e1   : > { %v747_v43 = vsel %vm707_vm10, %v717_v20, 0.0 }
 0x1e3   : > { %v691_v44 = vpop.permute.xlu1 %690  ;;  %v780_v45 = vpop.permute.xlu0 %779 }
 0x1e4   : > { %vm709_vm12 = vcmp.eq.s32.totalorder %v691_v44, %v2565_v14  ;;  %vm792_vm13 = vcmp.eq.s32.totalorder %v780_v45, %v2565_v14 }
 0x1e5   : > { %v749_v46 = vsel %vm709_vm12, %v725_v24, 0.0 }
 0x1e6   : > { %v757_v47 = vadd.f32 %v749_v46, %v669_v31 }
 0x1e7   : > { %v694_v48 = vpop.permute.xlu1 %693  ;;  %v786_v49 = vpop.permute.xlu0 %785 }
 0x1e8   : > { %vm710_vm14 = vcmp.eq.s32.totalorder %v694_v48, %v2565_v14  ;;  %vm794_vm15 = vcmp.eq.s32.totalorder %v786_v49, %v2565_v14 }
 0x1eb   : > { %v700_v50 = vpop.permute.xlu1 %699  ;;  %v801_v51 = vpop.permute.xlu0 %800 }
 0x1ec   : > { %vm712_vm0 = vcmp.eq.s32.totalorder %v700_v50, %v2565_v14 }
 0x1ef   : > { %v706_v52 = vpop.permute.xlu1 %705  ;;  %v809_v53 = vpop.permute.xlu0 %808 }
 0x1f0   : > { %vm714_vm1 = vcmp.eq.s32.totalorder %v706_v52, %v2565_v14  ;;  %v830_v54 = vsel %vm790_vm11, %v809_v53, 0.0 }
 0x1f3   : > { %v721_v55 = vpop.permute.xlu1 %720  ;;  %v817_v56 = vpop.permute.xlu0 %816 }
 0x1f4   : > { %v748_v57 = vsel %vm708_vm3, %v721_v55, 0.0  ;;  %v2628_v58 = vsel %vm792_vm13, %v817_v56, 0.0 }
 0x1f7   : > { %v729_v59 = vpop.permute.xlu1 %728  ;;  %v825_v60 = vpop.permute.xlu0 %824 }
 0x1f8   : > { %v750_v61 = vsel %vm710_vm14, %v729_v59, 0.0  ;;  %v2630_v62 = vsel %vm794_vm15, %v825_v60, 0.0 }
 0x1fb   : > { %v737_v63 = vpop.permute.xlu1 %736 }
 0x1fc   : > { %v752_v1 = vsel %vm712_vm0, %v737_v63, 0.0  ;;  %v848_v2 = vpop.permute.xlu0 %847 }
 0x1ff   : > { %v745_v3 = vpop.permute.xlu1 %744 }
 0x200   : > { %v754_v5 = vsel %vm714_vm1, %v745_v3, 0.0  ;;  %v881_v6 = vpop.permute.xlu0 %880 }
 0x204   : > { %v768_v7 = vpop.permute.xlu1 %767  ;;  %v2632_v9 = vpop.permute.xlu0 %853 }
 0x205   : > { %vm788_vm3 = vcmp.eq.s32.totalorder %v768_v7, %v2565_v14  ;;  %vm870_vm14 = vcmp.eq.s32.totalorder %v2632_v9, %v2565_v14 }
 0x206   : > { %v828_v11 = vsel %vm788_vm3, %v801_v51, 0.0  ;;  %vm1483_vm3 = vcmask 130112  }
 0x208   : > { %v771_v12 = vpop.permute.xlu1 %770  ;;  %v2635_v13 = vpop.permute.xlu0 %859 }
 0x209   : > { %vm789_vm4 = vcmp.eq.s32.totalorder %v771_v12, %v2565_v14  ;;  %vm872_vm0 = vcmp.eq.s32.totalorder %v2635_v13, %v2565_v14 }
 0x20c   : > { %v777_v15 = vpop.permute.xlu1 %776  ;;  %v2638_v16 = vpop.permute.xlu0 %865 }
 0x20d   : > { %vm791_vm5 = vcmp.eq.s32.totalorder %v777_v15, %v2565_v14  ;;  %vm874_vm6 = vcmp.eq.s32.totalorder %v2638_v16, %v2565_v14 }
 0x210   : > { %v783_v17 = vpop.permute.xlu1 %782 }
 0x211   : > { %vm793_vm7 = vcmp.eq.s32.totalorder %v783_v17, %v2565_v14  ;;  %v597_v8 = vpop.permute.xlu0 %596 }
 0x212   : > { %vm619_vm8 = vcmp.eq.s32.totalorder %v597_v8, %v2565_v14 }
 0x213   : > { %v667_v18 = vsel %vm619_vm8, %v2589_v23, 0.0 }
 0x214   : > { %v797_v19 = vpop.permute.xlu1 %796  ;;  %v755_v20 = vadd.f32 %v747_v43, %v667_v18 }
 0x215   : > { %v827_v21 = vsel %vm787_vm9, %v797_v19, 0.0  ;;  %vm868_vm9 = vcmp.eq.s32.totalorder %v848_v2, %v2565_v14 }
 0x216   : > { %v835_v22 = vadd.f32 %v827_v21, %v755_v20  ;;  %v908_v39 = vsel %vm868_vm9, %v881_v6, 0.0 }
 0x217   : > { %v606_v24 = vpop.permute.xlu0 %605 }
 0x218   : > { %v805_v25 = vpop.permute.xlu1 %804  ;;  %vm622_vm10 = vcmp.eq.s32.totalorder %v606_v24, %v2565_v14 }
 0x219   : > { %v829_v26 = vsel %vm789_vm4, %v805_v25, 0.0  ;;  %vm1583_vm4 = vcmask 125952  }
 0x21a   : > { %v837_v27 = vadd.f32 %v829_v26, %v757_v47 }
 0x21b   : > { %v612_v28 = vpop.permute.xlu0 %611 }
 0x21c   : > { %v813_v29 = vpop.permute.xlu1 %812  ;;  %vm624_vm11 = vcmp.eq.s32.totalorder %v612_v28, %v2565_v14 }
 0x21d   : > { %v831_v30 = vsel %vm791_vm5, %v813_v29, 0.0 }
 0x21e   : > { %v839_v31 = vadd.f32 %v831_v30, %v2606_v37 }
 0x21f   : > { %v618_v23 = vpop.permute.xlu0 %617 }
 0x220   : > { %v821_v32 = vpop.permute.xlu1 %820 }
 0x221   : > { %v833_v33 = vsel %vm793_vm7, %v821_v32, 0.0 }
 0x222   : > { %v841_v34 = vadd.f32 %v833_v33, %v2610_v41 }
 0x223   : > { %v635_v35 = vpop.permute.xlu0 %634 }
 0x224   : > { %v668_v36 = vsel %vm620_vm2, %v635_v35, 0.0  ;;  %vm626_vm2 = vcmp.eq.s32.totalorder %v618_v23, %v2565_v14 }
 0x225   : > { %v756_v38 = vadd.f32 %v748_v57, %v668_v36 }
 0x227   : > { %v845_v40 = vpop.permute.xlu1 %844  ;;  %v836_v37 = vadd.f32 %v828_v11, %v756_v38 }
 0x228   : > { %v645_v4 = vpop.permute.xlu0 %644  ;;  %vm867_vm12 = vcmp.eq.s32.totalorder %v845_v40, %v2565_v14 }
 0x229   : > { %v670_v42 = vsel %vm622_vm10, %v645_v4, 0.0  ;;  %v2661_v43 = vadd.f32 %v908_v39, %v836_v37 }
 0x22a   : > { %v758_v41 = vadd.f32 %v750_v61, %v670_v42 }
 0x22b   : > { %v851_v44 = vpop.permute.xlu1 %850 }
 0x22c   : > { %v838_v45 = vadd.f32 %v830_v54, %v758_v41  ;;  %v655_v46 = vpop.permute.xlu0 %654  ;;  %vm869_vm13 = vcmp.eq.s32.totalorder %v851_v44, %v2565_v14 }
 0x22d   : > { %v672_v0 = vsel %vm624_vm11, %v655_v46, 0.0 }
 0x22e   : > { %v760_v47 = vadd.f32 %v752_v1, %v672_v0 }
 0x22f   : > { %v877_v48 = vpop.permute.xlu1 %876 }
 0x230   : > { %v907_v49 = vsel %vm867_vm12, %v877_v48, 0.0  ;;  %v840_v50 = vadd.f32 %v2628_v58, %v760_v47  ;;  %v665_v51 = vpop.permute.xlu0 %664  ;;  %v1478_v47 = vadd.s32 4294967288, %v2565_v14  ;;  %v2695_v48 = vsub.s32 %v2565_v14, %v2413_v10 }
 0x231   : > { %v674_v52 = vsel %vm626_vm2, %v665_v51, 0.0  ;;  %v2668_v53 = vadd.f32 %v907_v49, %v835_v22 }
 0x232   : > { %v762_v55 = vadd.f32 %v754_v5, %v674_v52  ;;  %v2698_v49 = vsub.s32 %v1478_v47, %v2413_v10 }
 0x233   : > { %v885_v56 = vpop.permute.xlu1 %884 }
 0x234   : > { %v909_v54 = vsel %vm869_vm13, %v885_v56, 0.0  ;;  %v842_v57 = vadd.f32 %v2630_v62, %v762_v55 }
 0x235   : > { %v2671_v59 = vadd.f32 %v909_v54, %v837_v27 }
 0x237   : > { %v857_v60 = vpop.permute.xlu1 %856 }
 0x238   : > { %vm871_vm15 = vcmp.eq.s32.totalorder %v857_v60, %v2565_v14 }
 0x23b   : > { %v889_v61 = vpop.permute.xlu1 %888 }
 0x23c   : > { %v910_v63 = vsel %vm870_vm14, %v889_v61, 0.0 }
 0x23d   : > { %v2676_v58 = vadd.f32 %v910_v63, %v838_v45 }
 0x23f   : > { %v893_v1 = vpop.permute.xlu1 %892 }
 0x240   : > { %v911_v2 = vsel %vm871_vm15, %v893_v1, 0.0 }
 0x241   : > { %v2678_v3 = vadd.f32 %v911_v2, %v839_v31 }
 0x243   : > { %v863_v5 = vpop.permute.xlu1 %862 }
 0x244   : > { %vm873_vm1 = vcmp.eq.s32.totalorder %v863_v5, %v2565_v14 }
 0x247   : > { %v897_v62 = vpop.permute.xlu1 %896 }
 0x248   : > { %v912_v6 = vsel %vm872_vm0, %v897_v62, 0.0 }
 0x249   : > { %v2683_v7 = vadd.f32 %v912_v6, %v840_v50 }
 0x24b   : > { %v901_v9 = vpop.permute.xlu1 %900 }
 0x24c   : > { %v913_v11 = vsel %vm873_vm1, %v901_v9, 0.0 }
 0x24d   : > { %v2685_v12 = vadd.f32 %v913_v11, %v841_v34 }
 0x24f   : > { %v905_v15 = vpop.permute.xlu1 %904 }
 0x250   : > { %v914_v17 = vsel %vm874_vm6, %v905_v15, 0.0 }
 0x251   : > { %v2690_v8 = vadd.f32 %v914_v17, %v842_v57 }
 0x26c   : > { %v1060_v18 = vpop.f32.mrb[4].mxu0 }
 0x26d   : > { %1427 = vperm.xlu1 %2055, %v1060_v18   ;;  %v1932_v13 = vpop.f32.mrb[5].mxu0 }
 0x26e   : > { %v1063_v19 = vpop.f32.mrb[6].mxu0 }
 0x26f   : > { %1430 = vperm.xlu0 %2054, %v1063_v19   ;;  %v1933_v20 = vpop.f32.mrb[7].mxu0 }
 0x270   : > { %v1109_v21 = vpop.f32.mrb[4].mxu1 }
 0x271   : > { %v1940_v22 = vpop.f32.mrb[5].mxu1  ;;  %1433 = vperm.xlu1 %2055, %v1109_v21  }
 0x272   : > { %v1112_v24 = vpop.f32.mrb[6].mxu1 }
 0x273   : > { %v1941_v25 = vpop.f32.mrb[7].mxu1 }
 0x274   : > { %v1158_v26 = vpop.f32.mrb[8].mxu0 }
 0x275   : > { %1436 = vperm.xlu1 %2055, %v1112_v24   ;;  %v1948_v27 = vpop.f32.mrb[9].mxu0 }
 0x276   : > { %v1161_v28 = vpop.f32.mrb[10].mxu0 }
 0x277   : > { %1442 = vperm.xlu0 %2054, %v1161_v28   ;;  %v1949_v16 = vpop.f32.mrb[11].mxu0 }
 0x278   : > { %v1207_v29 = vpop.f32.mrb[8].mxu1 }
 0x279   : > { %v1956_v30 = vpop.f32.mrb[9].mxu1  ;;  %1439 = vperm.xlu1 %2055, %v1158_v26  }
 0x27a   : > { %v1210_v31 = vpop.f32.mrb[10].mxu1 }
 0x27b   : > { %v1957_v23 = vpop.f32.mrb[11].mxu1  ;;  %1445 = vperm.xlu0 %2054, %v1207_v29  }
 0x27c   : > { %v1256_v32 = vpop.f32.mrb[12].mxu0 }
 0x27d   : > { %1448 = vperm.xlu1 %2055, %v1210_v31   ;;  %v1964_v33 = vpop.f32.mrb[13].mxu0 }
 0x27e   : > { %v1259_v34 = vpop.f32.mrb[14].mxu0 }
 0x27f   : > { %1454 = vperm.xlu0 %2054, %v1259_v34   ;;  %v1965_v35 = vpop.f32.mrb[15].mxu0 }
 0x280   : > { %v1305_v36 = vpop.f32.mrb[12].mxu1 }
 0x281   : > { %v1972_v38 = vpop.f32.mrb[13].mxu1  ;;  %1451 = vperm.xlu1 %2055, %v1256_v32  }
 0x282   : > { %v1308_v39 = vpop.f32.mrb[14].mxu1 }
 0x283   : > { %v1973_v40 = vpop.f32.mrb[15].mxu1  ;;  %1457 = vperm.xlu0 %2054, %v1305_v36  }
 0x284   : > { %v1354_v37 = vpop.f32.mrb[16].mxu0 }
 0x285   : > { %1460 = vperm.xlu1 %2055, %v1308_v39   ;;  %v1980_v4 = vpop.f32.mrb[17].mxu0 }
 0x286   : > { %v1357_v42 = vpop.f32.mrb[18].mxu0 }
 0x287   : > { %1466 = vperm.xlu0 %2054, %v1357_v42   ;;  %v1981_v41 = vpop.f32.mrb[19].mxu0 }
 0x288   : > { %v1403_v44 = vpop.f32.mrb[16].mxu1 }
 0x289   : > { %v1988_v45 = vpop.f32.mrb[17].mxu1  ;;  %1463 = vperm.xlu1 %2055, %v1354_v37  }
 0x28a   : > { %v1406_v46 = vpop.f32.mrb[18].mxu1 }
 0x28b   : > { %v1989_v0 = vpop.f32.mrb[19].mxu1  ;;  %1472 = vperm.xlu0 %2054, %v1406_v46  }
 0x28d   : > { %1469 = vperm.xlu1 %2055, %v1403_v44  }
 0x2ec   : > { %v1428_v50 = vpop.permute.xlu1 %1427 }
 0x2ed   : > { %v1477_v52 = vrot.slane %v1428_v50, %v2695_v48 }
 0x2ee   : > { %v1431_v51 = vpop.permute.xlu0 %1430 }
 0x2ef   : > { %v1482_v55 = vrot.slane %v1431_v51, %v2698_v49 }
 0x2f0   : > { %v1434_v56 = vpop.permute.xlu1 %1433 }
 0x2f1   : > { %v1484_v54 = vsel %vm1483_vm3, %v1482_v55, %v1477_v52  ;;  %v1488_v61 = vrot.slane %v1434_v56, %v2695_v48 }
 0x2f2   : > { %v1575_v57 = vmul.f32 %v1484_v54, %v2668_v53 }
 0x2f4   : > { %v1437_v60 = vpop.permute.xlu1 %1436  ;;  %v1584_v14 = vsel %vm1583_vm4, %v1575_v57, 0.0 }
 0x2f5   : > { %v1492_v10 = vrot.slane %v1437_v60, %v2698_v49  ;;  %1585 = vadd.xlane.f32.xlu1 %v1584_v14 }
 0x2f6   : > { %v1443_v63 = vpop.permute.xlu0 %1442 }
 0x2f7   : > { %v1493_v1 = vsel %vm1483_vm3, %v1492_v10, %v1488_v61  ;;  %v1501_v62 = vrot.slane %v1443_v63, %v2698_v49 }
 0x2f8   : > { %v1440_v2 = vpop.permute.xlu1 %1439  ;;  %v1576_v5 = vmul.f32 %v1493_v1, %v2661_v43 }
 0x2f9   : > { %v1497_v6 = vrot.slane %v1440_v2, %v2695_v48 }
 0x2fa   : > { %v1446_v9 = vpop.permute.xlu0 %1445  ;;  %v1587_v53 = vsel %vm1583_vm4, %v1576_v5, 0.0 }
 0x2fb   : > { %1588 = vadd.xlane.f32.xlu0 %v1587_v53  ;;  %v1502_v11 = vsel %vm1483_vm3, %v1501_v62, %v1497_v6  ;;  %v1506_v18 = vrot.slane %v1446_v9, %v2695_v48 }
 0x2fc   : > { %v1449_v15 = vpop.permute.xlu1 %1448  ;;  %v1577_v17 = vmul.f32 %v1502_v11, %v2671_v59 }
 0x2fd   : > { %v1510_v13 = vrot.slane %v1449_v15, %v2698_v49 }
 0x2fe   : > { %v1455_v19 = vpop.permute.xlu0 %1454  ;;  %v1590_v43 = vsel %vm1583_vm4, %v1577_v17, 0.0 }
 0x2ff   : > { %1591 = vadd.xlane.f32.xlu0 %v1590_v43  ;;  %v1511_v20 = vsel %vm1483_vm3, %v1510_v13, %v1506_v18  ;;  %v1519_v24 = vrot.slane %v1455_v19, %v2698_v49 }
 0x300   : > { %v1452_v21 = vpop.permute.xlu1 %1451  ;;  %v1578_v22 = vmul.f32 %v1511_v20, %v2676_v58 }
 0x301   : > { %v1515_v25 = vrot.slane %v1452_v21, %v2695_v48 }
 0x302   : > { %v1458_v26 = vpop.permute.xlu0 %1457  ;;  %v1593_v59 = vsel %vm1583_vm4, %v1578_v22, 0.0 }
 0x303   : > { %1594 = vadd.xlane.f32.xlu1 %v1593_v59  ;;  %v1520_v27 = vsel %vm1483_vm3, %v1519_v24, %v1515_v25  ;;  %v1524_v29 = vrot.slane %v1458_v26, %v2695_v48 }
 0x304   : > { %v1461_v28 = vpop.permute.xlu1 %1460  ;;  %v1579_v16 = vmul.f32 %v1520_v27, %v2678_v3 }
 0x305   : > { %v1528_v30 = vrot.slane %v1461_v28, %v2698_v49 }
 0x306   : > { %v1467_v31 = vpop.permute.xlu0 %1466  ;;  %v1596_v58 = vsel %vm1583_vm4, %v1579_v16, 0.0 }
 0x307   : > { %1597 = vadd.xlane.f32.xlu0 %v1596_v58  ;;  %v1529_v23 = vsel %vm1483_vm3, %v1528_v30, %v1524_v29  ;;  %v1537_v34 = vrot.slane %v1467_v31, %v2698_v49 }
 0x308   : > { %v1464_v32 = vpop.permute.xlu1 %1463  ;;  %v1580_v33 = vmul.f32 %v1529_v23, %v2683_v7 }
 0x309   : > { %v1533_v35 = vrot.slane %v1464_v32, %v2695_v48 }
 0x30a   : > { %v1473_v3 = vpop.permute.xlu0 %1472  ;;  %v1599_v36 = vsel %vm1583_vm4, %v1580_v33, 0.0 }
 0x30b   : > { %1600 = vadd.xlane.f32.xlu1 %v1599_v36  ;;  %v1538_v38 = vsel %vm1483_vm3, %v1537_v34, %v1533_v35  ;;  %v1546_v7 = vrot.slane %v1473_v3, %v2698_v49 }
 0x30c   : > { %v1470_v39 = vpop.permute.xlu1 %1469  ;;  %v1581_v40 = vmul.f32 %v1538_v38, %v2685_v12 }
 0x30d   : > { %v1542_v37 = vrot.slane %v1470_v39, %v2695_v48 }
 0x30e   : > { %v1602_v4 = vsel %vm1583_vm4, %v1581_v40, 0.0 }
 0x30f   : > { %1603 = vadd.xlane.f32.xlu0 %v1602_v4  ;;  %v1547_v42 = vsel %vm1483_vm3, %v1546_v7, %v1542_v37 }
 0x310   : > { %v1582_v41 = vmul.f32 %v1547_v42, %v2690_v8 }
 0x312   : > { %v1605_v44 = vsel %vm1583_vm4, %v1582_v41, 0.0 }
 0x313   : > { %1606 = vadd.xlane.f32.xlu1 %v1605_v44 }
 0x314   : > { %2111 = shalt.err (!%p2108_p5)
}
 0x315   : > { %s2112_s16 = scalar_lea.hbm %s2746_s29, 128  ;;  %s2116_s14 = scalar_lea.hbm %s2834_s8, 256 }
 0x316   : > { %p2113_p8 = scmp.ne.s32.totalorder %s2746_s29, %s2112_s16  ;;  %p2117_p1 = scmp.lt.u32.totalorder %s2746_s29, %s2834_s8 }
 0x317   : > { %p2118_p3 = scmp.lt.u32.totalorder %s2116_s14, %s2112_s16  ;;  %p2120_p11 = scmp.lt.u32.totalorder %s2112_s16, %s2746_s29 }
 0x318   : > { %p2114_p9 = pnand %p2113_p8, %p2846_p12 }
 0x319   : > { %p2119_p6 = por %p2118_p3, %p2117_p1 }
 0x31a   : > { %p2115_p0 = pneg %p2114_p9 }
 0x31b   : > { %p2121_p13 = por %p2120_p11, %p2119_p6 }
 0x31d   : > { %p2122_p7 = pnand %p2121_p13, %p2115_p0 }
 0x31f   : > { %2125 = shalt.err (!%p2122_p7)
}
 0x320   : > { %1992 = dma.vmem_to_hbm [thread:$0]  (%p2846_p12), %s1683_s17, 128, %s2746_s29, %s1664_s23   ;;  %vm1548_vm5 = vcmask 1041409   ;;  %vm1549_vm6 = vcmask 1042434   ;;  %vm1551_vm7 = vcmask 1043459   ;;  %vm1651_vm8 = vcmask 1044484  }
 0x321   : > { %vm1653_vm9 = vcmask 1045509   ;;  %vm1655_vm10 = vcmask 1046534   ;;  %vm1657_vm11 = vcmask 1047559   ;;  %s2847_s26 = sshll.u32 %s2362_s24, 3  ;;  %vm1660_vm12 = vcmask 31744   ;;  %s2848_s17 = sshll.u32 %s2278_s13, 7 }
 0x322   : > { %s408_s19 = scalar_lea.vmem [#allocation6], %s2847_s26  ;;  %s2782_s16 = scalar_lea.hbm %s2835_s9, %s2848_s17 }
 0x323   : > { %s1695_s29 = sshll.u32 %s408_s19, 4  ;;  %s1669_s25 = scalar_lea.sflag [#allocation7], %s2362_s24  ;;  %s2784_s29 = int_to_ptr.vmem [resolvable:$true] %s1695_s29 }
 0x324   : > { %s2126_s27 = scalar_lea.vmem %s2784_s29, 128  ;;  %s2206_s14 = smov [#allocation6]  }
 0x325   : > { %p2127_p10 = scmp.ne.s32.totalorder %s2784_s29, %s2126_s27  ;;  %s2130_s13 = sshll.u32 %s2206_s14, 4  ;;  %s2131_s13 = int_to_ptr.vmem [resolvable:$false] %s2130_s13 }
 0x326   : > { %s2132_s20 = scalar_lea.vmem %s2131_s13, 256  ;;  %p2133_p5 = scmp.lt.s32.totalorder %s2784_s29, %s2131_s13 }
 0x327   : > { %p2128_p2 = pnand %p2127_p10, %p2846_p12  ;;  %p2134_p8 = scmp.lt.s32.totalorder %s2132_s20, %s2126_s27 }
 0x329   : > { %p2129_p4 = pneg %p2128_p2  ;;  %p2135_p9 = por %p2134_p8, %p2133_p5 }
 0x32b   : > { %p2136_p0 = pnand %p2135_p9, %p2129_p4 }
 0x382   : > { %v1586_v8 = vpop.xlane.xlu1 %1585 }
 0x383   : > { %v1619_v51 = vrot.slane %v1586_v8, %v2695_v48 }
 0x388   : > { %v1589_v12 = vpop.xlane.xlu0 %1588 }
 0x389   : > { %v1623_v47 = vrot.slane %v1589_v12, %v2695_v48 }
 0x38b   : > { %v1648_v54 = vsel %vm1548_vm5, %v1623_v47, %v1619_v51 }
 0x38c   : > { %v1592_v45 = vpop.xlane.xlu0 %1591 }
 0x38d   : > { %v1627_v49 = vrot.slane %v1592_v45, %v2695_v48 }
 0x38f   : > { %v1649_v60 = vsel %vm1549_vm6, %v1627_v49, %v1648_v54 }
 0x390   : > { %v1595_v46 = vpop.xlane.xlu1 %1594 }
 0x391   : > { %v1631_v52 = vrot.slane %v1595_v46, %v2695_v48 }
 0x393   : > { %v1650_v61 = vsel %vm1551_vm7, %v1631_v52, %v1649_v60 }
 0x394   : > { %v1598_v0 = vpop.xlane.xlu0 %1597 }
 0x395   : > { %v1635_v55 = vrot.slane %v1598_v0, %v2695_v48 }
 0x397   : > { %v1652_v10 = vsel %vm1651_vm8, %v1635_v55, %v1650_v61 }
 0x398   : > { %v1601_v50 = vpop.xlane.xlu1 %1600 }
 0x399   : > { %v1639_v57 = vrot.slane %v1601_v50, %v2695_v48 }
 0x39b   : > { %v1654_v1 = vsel %vm1653_vm9, %v1639_v57, %v1652_v10 }
 0x39c   : > { %v1604_v56 = vpop.xlane.xlu0 %1603 }
 0x39d   : > { %v1643_v14 = vrot.slane %v1604_v56, %v2695_v48 }
 0x39f   : > { %v1656_v5 = vsel %vm1655_vm10, %v1643_v14, %v1654_v1 }
 0x3a0   : > { %v1607_v63 = vpop.xlane.xlu1 %1606 }
 0x3a1   : > { %v1647_v2 = vrot.slane %v1607_v63, %v2695_v48 }
 0x3a3   : > { %v1658_v62 = vsel %vm1657_vm11, %v1647_v2, %v1656_v5 }
 0x3a4   : > { %v1661_v6 = vsel %vm1660_vm12, %v1658_v62, 0.0 }
 0x3a5   : > { %1662 = vst [vmem:[%s408_s19] sm:$0xff] %v1661_v6 }
 0x3a6   : > { %2139 = shalt.err (!%p2136_p0)
}
 0x3a7   : > { %s2140_s24 = scalar_lea.hbm %s2782_s16, 128  ;;  %s2144_s17 = scalar_lea.hbm %s2835_s9, 256 }
 0x3a8   : > { %p2141_p1 = scmp.ne.s32.totalorder %s2782_s16, %s2140_s24  ;;  %p2145_p11 = scmp.lt.u32.totalorder %s2782_s16, %s2835_s9 }
 0x3a9   : > { %p2146_p13 = scmp.lt.u32.totalorder %s2144_s17, %s2140_s24  ;;  %p2148_p10 = scmp.lt.u32.totalorder %s2140_s24, %s2782_s16 }
 0x3aa   : > { %p2142_p3 = pnand %p2141_p1, %p2846_p12 }
 0x3ab   : > { %p2147_p7 = por %p2146_p13, %p2145_p11 }
 0x3ac   : > { %p2143_p6 = pneg %p2142_p3 }
 0x3ad   : > { %p2149_p2 = por %p2148_p10, %p2147_p7 }
 0x3af   : > { %p2150_p4 = pnand %p2149_p2, %p2143_p6 }
 0x3b1   : > { %2153 = shalt.err (!%p2150_p4)
}
 0x3b2   : > { %1993 = dma.vmem_to_hbm [thread:$0]  (%p2846_p12), %s2784_s29, 128, %s2782_s16, %s1669_s25  }
 0x3b3 PF: > { %s1707_s27 = sand.u32 1, %s2184_s30   ;;  %p2849_p5 = scmp.ne.s32.totalorder %s2842_s22, 0 }
 0x3b4   : > { %p2850_p8 = scmp.ge.s32.totalorder %s2196_s12, 2  ;;  %s1708_s14 = scalar_lea.sflag [#allocation4], %s1707_s27 }
 0x3b6   : > { %p2001_p9 = pnand %p2850_p8, %p2849_p5 }
 0x3b8   : > { %2175 = dma.done.wait (!%p2001_p9), %s1708_s14, 128  }
 0x3b9   : > { %2177 = vsyncadd (!%p2001_p9), %s1708_s14, 4294967168  ;;  %s1717_s13 = scalar_lea.sflag [#allocation7], %s1707_s27 }
 0x3ba   : > { %2179 = dma.done.wait (!%p2001_p9), %s1717_s13, 128  }
 0x3bb   : > { %2181 = vsyncadd (!%p2001_p9), %s1717_s13, 4294967168  ;;  %p26_p12 = scmp.ge.s32.totalorder %s2282_s15, 4   ;;  %s2851_s30 = smov %s2188_s10 }
 0x3bc   : > { %s2852_s10 = smov %s2192_s11  ;;  %s2853_s11 = smov %s2294_s18 }
 0x3bd   : > { %s2854_s12 = smov %s2282_s15  ;;  %28 = sbr.rel (!%p26_p12) target bundleno = 7 (0x7), region = 123 }
 0x3c4   :  { %1722 = vsyncpa [#allocation3], 1 }
 0x3c5   :  { %1724 = vsyncpa [#allocation3 + $0x1], 1 }
 0x3c6   :  { %1725 = vsyncpa [#allocation4], 1 }
 0x3c7   :  { %1727 = vsyncpa [#allocation4 + $0x1], 1 }
 0x3c8   :  { %1728 = vsyncpa [#allocation7], 1 }
 0x3c9   :  { %1730 = vsyncpa [#allocation7 + $0x1], 1 }

</bundles_post_ra>
